<compile_context>
chip_gen: v7x
topology: tpu7x:2x2x1
jax: 0.10.0
libtpu: 0.0.40
codegen_flags: <defaults>
</compile_context>

<pallas_src>
import jax
import jax.numpy as jnp
from jax import lax
from jax.experimental import pallas as pl
from jax.experimental.pallas import tpu as pltpu

KSIZE = 7
PAD = 3
NACC = 4        # independent accumulators in the VPU conv fallback
CCHUNK = 8      # channels reduced per (unrolled) loop iteration


# ---------------------------------------------------------------------------
# Static planning helpers.
# ---------------------------------------------------------------------------
def _vmem_capacity_bytes():
    try:
        cap = getattr(pltpu.get_tpu_info(), "vmem_capacity_bytes", None)
        if cap:
            return int(cap)
    except Exception:
        pass
    return 64 * 1024 * 1024     # conservative default (v7x physical VMEM)


def _largest_divisor_leq(n, cap):
    cap = max(1, min(n, int(cap)))
    for d in range(cap, 0, -1):
        if n % d == 0:
            return d
    return 1


def _plan_reduce(N, C, HW, itemsize, vmem_cap, max_channels_per_tile):
    """Pick (NB images, TC channels) per grid step for the reduction kernel."""
    chan_bytes = HW * itemsize
    img_bytes = C * chan_bytes
    # Per-input-buffer budget; the x block is double-buffered by the pipeline.
    tile_budget = max(2 << 20, min(vmem_cap // 8, 16 << 20))

    cap_c = C if max_channels_per_tile is None else max(1, min(C, int(max_channels_per_tile)))

    if cap_c >= C and img_bytes <= tile_budget:
        # All channels fit in one block: single channel tile, batch images.
        TC = C
        nb_cap = max(1, tile_budget // max(1, img_bytes))
        if N >= 2:                      # keep >= 2 parallel steps (v7x megacore)
            nb_cap = min(nb_cap, max(1, N // 2))
        NB = _largest_divisor_leq(N, nb_cap)
    else:
        NB = 1
        budget_c = max(1, tile_budget // max(1, chan_bytes))
        want = min(C, cap_c, budget_c)
        if C <= CCHUNK or want >= C:
            TC = C                      # channels cannot be tiled below 8 rows
        else:
            # Channel tiles must be a multiple of 8 (sublane tiling) unless
            # they cover the full channel dim; prefer a divisor of C.
            cap8 = max(8, (want // 8) * 8)
            TC = None
            d = cap8
            while d >= 8:
                if C % d == 0:
                    TC = d
                    break
                d -= 8
            if TC is None:
                TC = cap8               # last tile is statically shorter

    num_c_tiles = -(-C // TC)
    tail_valid = C - (num_c_tiles - 1) * TC

    block_bytes = NB * TC * HW * itemsize
    out_bytes = NB * 2 * HW * 4
    scratch_bytes = (2 * NB * HW * 4) if num_c_tiles > 1 else 0
    working_bytes = 4 * NB * HW * 4
    need = 2 * block_bytes + 2 * out_bytes + scratch_bytes + working_bytes + (2 << 20)
    vmem_limit = min(int(vmem_cap * 0.9), max(32 << 20, need))
    if need > vmem_limit:
        # TODO(synk): spatial (H*W) tiling for feature maps that do not fit VMEM.
        raise NotImplementedError(
            "SpatialAttention Pallas kernel: a single (channels x H*W) tile needs "
            f"~{need >> 20} MiB of VMEM (capacity ~{vmem_cap >> 20} MiB); spatial "
            "tiling is not implemented.")
    return NB, TC, num_c_tiles, tail_valid, vmem_limit


# ---------------------------------------------------------------------------
# Kernel 1: lane-dense channel sum + max reduction.
# ---------------------------------------------------------------------------
def _make_reduce_kernel(C, TC, NB, HW, num_c_tiles, tail_valid):
    inv_c = 1.0 / C

    def accumulate(x_ref, nvalid, carry):
        """Fold `nvalid` leading channels of the current block into (sum, max)."""
        nchunks = nvalid // CCHUNK
        rem = nvalid - nchunks * CCHUNK

        def one_chunk(chunk, s, m):
            # Sum accumulates in f32; max is reduced in the native dtype
            # (exact) and cast once per chunk.
            s = s + jnp.sum(chunk.astype(jnp.float32), axis=1)
            m = jnp.maximum(m, jnp.max(chunk, axis=1).astype(jnp.float32))
            return s, m

        s, m = carry
        if nchunks > 0:
            def body(k, sm):
                start = pl.multiple_of(k * CCHUNK, CCHUNK)
                return one_chunk(x_ref[:, pl.ds(start, CCHUNK), :], *sm)
            s, m = lax.fori_loop(0, nchunks, body, (s, m),
                                 unroll=nchunks if nchunks <= 8 else 8)
        if rem > 0:
            lo = nchunks * CCHUNK                      # static slice, no masking
            s, m = one_chunk(x_ref[:, lo:lo + rem, :], s, m)
        return s, m

    def write_out(am_ref, s, m):
        am_ref[:, 0, :] = s * inv_c
        am_ref[:, 1, :] = m

    if num_c_tiles == 1:
        def kernel(x_ref, am_ref):
            s0 = jnp.zeros((NB, HW), jnp.float32)
            m0 = jnp.full((NB, HW), -jnp.inf, jnp.float32)
            s, m = accumulate(x_ref, C, (s0, m0))
            write_out(am_ref, s, m)
        return kernel

    def kernel(x_ref, am_ref, sum_ref, max_ref):
        c = pl.program_id(1)
        last = num_c_tiles - 1

        @pl.when(c == 0)
        def _():
            sum_ref[...] = jnp.zeros((NB, HW), jnp.float32)
            max_ref[...] = jnp.full((NB, HW), -jnp.inf, jnp.float32)

        @pl.when(c < last)
        def _():
            s, m = accumulate(x_ref, TC, (sum_ref[...], max_ref[...]))
            sum_ref[...] = s
            max_ref[...] = m

        @pl.when(c == last)
        def _():
            # Fresh carries go straight to the output (no scratch round trip);
            # the tail tile uses a statically shorter reduction (tail_valid).
            s, m = accumulate(x_ref, tail_valid, (sum_ref[...], max_ref[...]))
            write_out(am_ref, s, m)

    return kernel


# ---------------------------------------------------------------------------
# Kernel 2: 7x7 conv over (avg, max) + sigmoid.
# ---------------------------------------------------------------------------
def _banded_weights(conv_weight, W):
    """(2, 7, W+6, W) f32 with band[c, dh, w+dw, w] = conv_weight[0, c, dh, dw]."""
    Wp = W + 2 * PAD
    i = jnp.arange(Wp)[:, None]
    j = jnp.arange(W)[None, :]
    d = i - j
    valid = (d >= 0) & (d < KSIZE)
    dcl = jnp.clip(d, 0, KSIZE - 1)
    w2 = conv_weight[0].astype(jnp.float32)            # (2, 7, 7)
    return jnp.where(valid[None, None], w2[:, :, dcl], 0.0)


def _make_conv_kernel(NB2, H, W, conv_on_mxu):
    Wp = W + 2 * PAD
    P = H + 2 * PAD

    def pad_hw(a):                                     # (NB2, H, W) -> (NB2, P, Wp)
        zr = jnp.zeros((NB2, PAD, W), jnp.float32)
        a = jnp.concatenate([zr, a, zr], axis=1)
        zc = jnp.zeros((NB2, P, PAD), jnp.float32)
        return jnp.concatenate([zc, a, zc], axis=2)

    if conv_on_mxu:
        def kernel(w_ref, am_ref, o_ref):
            # w_ref : VMEM (2, 7, Wp, W) banded weights
            # am_ref: VMEM (NB2, 2, H, W) f32 -- avg / max planes
            pa = pad_hw(am_ref[:, 0, :, :])
            pm = pad_hw(am_ref[:, 1, :, :])
            if NB2 == 1:
                a2d, m2d = pa[0], pm[0]
            else:
                # Stack images along sublanes -> one 2-D matmul per (chan, dh).
                a2d = jnp.concatenate([pa[b] for b in range(NB2)], axis=0)
                m2d = jnp.concatenate([pm[b] for b in range(NB2)], axis=0)
            rows = NB2 * P - 2 * PAD
            acc = jnp.zeros((rows, W), jnp.float32)
            for dh in range(KSIZE):
                acc = acc + jnp.dot(a2d[dh:dh + rows, :], w_ref[0, dh],
                                    preferred_element_type=jnp.float32)
                acc = acc + jnp.dot(m2d[dh:dh + rows, :], w_ref[1, dh],
                                    preferred_element_type=jnp.float32)
            y = jax.nn.sigmoid(acc)
            for b in range(NB2):
                o_ref[b, 0] = y[b * P:b * P + H, :].astype(o_ref.dtype)
        return kernel

    def kernel(w_ref, am_ref, o_ref):
        # w_ref: SMEM (2*7*7,) f32, [c, kh, kw] row-major. Exact-f32 VPU taps.
        pa = pad_hw(am_ref[:, 0, :, :])
        pm = pad_hw(am_ref[:, 1, :, :])
        accs = [jnp.zeros((NB2, H, W), jnp.float32) for _ in range(NACC)]
        for dw in range(KSIZE):
            ca = pa[:, :, dw:dw + W]           # one lane shift per dw, reused
            cm = pm[:, :, dw:dw + W]
            for dh in range(KSIZE):
                wa = w_ref[dh * KSIZE + dw]
                wm = w_ref[KSIZE * KSIZE + dh * KSIZE + dw]
                k = dh % NACC
                accs[k] = accs[k] + (wa * ca[:, dh:dh + H, :]
                                     + wm * cm[:, dh:dh + H, :])
        parts = accs
        while len(parts) > 1:                 # tree-sum the partial accumulators
            parts = [parts[i] + parts[i + 1] if i + 1 < len(parts) else parts[i]
                     for i in range(0, len(parts), 2)]
        o_ref[:, 0, :, :] = jax.nn.sigmoid(parts[0]).astype(o_ref.dtype)
    return kernel


# ---------------------------------------------------------------------------
# Wrapper.
# ---------------------------------------------------------------------------
def spatial_attention(x, conv_weight, *, conv_on_mxu=None, max_channels_per_tile=None):
    """x: (N, C, H, W) f32/bf16; conv_weight: (1, 2, 7, 7)."""
    N, C, H, W = x.shape
    assert conv_weight.shape == (1, 2, KSIZE, KSIZE)
    HW = H * W
    if conv_on_mxu is None:
        conv_on_mxu = W <= 256          # keep banded weight matrices small in VMEM

    vmem_cap = _vmem_capacity_bytes()
    NB, TC, num_c_tiles, tail_valid, vmem_limit = _plan_reduce(
        N, C, HW, x.dtype.itemsize, vmem_cap, max_channels_per_tile)

    # ---- kernel 1: lane-dense channel reduction -> (N, 2, H*W) f32 ----------
    x_flat = x.reshape(N, C, HW)                       # free (bitcast) reshape
    reduce_kernel = _make_reduce_kernel(C, TC, NB, HW, num_c_tiles, tail_valid)
    scratch = ([pltpu.VMEM((NB, HW), jnp.float32)] * 2) if num_c_tiles > 1 else []
    am_flat = pl.pallas_call(
        reduce_kernel,
        out_shape=jax.ShapeDtypeStruct((N, 2, HW), jnp.float32),
        grid_spec=pltpu.PrefetchScalarGridSpec(
            num_scalar_prefetch=0,
            grid=(N // NB, num_c_tiles),
            in_specs=[pl.BlockSpec((NB, TC, HW), lambda b, c: (b, c, 0))],
            # Same output block across the channel (reduction) axis -> resident.
            out_specs=pl.BlockSpec((NB, 2, HW), lambda b, c: (b, 0, 0)),
            scratch_shapes=scratch,
        ),
        compiler_params=pltpu.CompilerParams(
            dimension_semantics=("parallel", "arbitrary"),
            vmem_limit_bytes=vmem_limit,
        ),
    )(x_flat)

    # ---- kernel 2: tiny 7x7 conv + sigmoid over (avg, max) ------------------
    am = am_flat.reshape(N, 2, H, W)                   # free (bitcast) reshape
    nb2_cap = 8 if N < 2 else min(8, max(1, N // 2))
    NB2 = _largest_divisor_leq(N, nb2_cap)
    conv_kernel = _make_conv_kernel(NB2, H, W, conv_on_mxu)
    if conv_on_mxu:
        w_operand = _banded_weights(conv_weight, W)
        w_spec = pl.BlockSpec((2, KSIZE, W + 2 * PAD, W), lambda b: (0, 0, 0, 0))
    else:
        w_operand = conv_weight.reshape(-1).astype(jnp.float32)
        w_spec = pl.BlockSpec(memory_space=pltpu.SMEM)

    out = pl.pallas_call(
        conv_kernel,
        out_shape=jax.ShapeDtypeStruct((N, 1, H, W), x.dtype),
        grid_spec=pltpu.PrefetchScalarGridSpec(
            num_scalar_prefetch=0,
            grid=(N // NB2,),
            in_specs=[w_spec,
                      pl.BlockSpec((NB2, 2, H, W), lambda b: (b, 0, 0, 0))],
            out_specs=pl.BlockSpec((NB2, 1, H, W), lambda b: (b, 0, 0, 0)),
        ),
        compiler_params=pltpu.CompilerParams(
            dimension_semantics=("parallel",),
        ),
    )(w_operand, am)
    return out


def spatial_attention_ref(x, conv_weight):
    """Plain-JAX reference mirroring the PyTorch module."""
    avg = jnp.mean(x, axis=1, keepdims=True)
    mx = jnp.max(x, axis=1, keepdims=True)
    cat = jnp.concatenate([avg, mx], axis=1)
    y = jax.lax.conv_general_dilated(
        cat, conv_weight, window_strides=(1, 1),
        padding=((PAD, PAD), (PAD, PAD)),
        dimension_numbers=("NCHW", "OIHW", "NCHW"))
    return jax.nn.sigmoid(y)


if __name__ == "__main__":
    key = jax.random.PRNGKey(0)
    kx, kw, kx2, kx3 = jax.random.split(key, 4)

    # Deterministic synthetic conv weights (PyTorch-like kaiming_uniform bound).
    fan_in = 2 * KSIZE * KSIZE
    bound = (6.0 / fan_in) ** 0.5
    conv_weight = jax.random.uniform(
        kw, (1, 2, KSIZE, KSIZE), dtype=jnp.float32, minval=-bound, maxval=bound)

    # 1) Base shapes, exact-f32 VPU conv path (tight tolerance).
    x = jax.random.normal(kx, (2, 4, 16, 16), dtype=jnp.float32)
    ref = spatial_attention_ref(x, conv_weight)
    out = jax.block_until_ready(spatial_attention(x, conv_weight, conv_on_mxu=False))
    assert out.shape == (2, 1, 16, 16)
    assert jnp.allclose(out, ref, atol=2e-5, rtol=1e-5), "VPU-conv path mismatch"

    # 2) Same input via the MXU banded-conv path (looser tolerance: the f32
    #    matmul may be decomposed into bf16 passes on the MXU).
    out_mxu = jax.block_until_ready(spatial_attention(x, conv_weight, conv_on_mxu=True))
    assert jnp.allclose(out_mxu, ref, atol=2e-2, rtol=1e-2), "MXU-conv path mismatch"

    # 3) Multi channel-tile path with a statically short tail (C=20 -> 8,8,4).
    x2 = jax.random.normal(kx2, (2, 20, 16, 16), dtype=jnp.float32)
    ref2 = spatial_attention_ref(x2, conv_weight)
    out2 = jax.block_until_ready(
        spatial_attention(x2, conv_weight, conv_on_mxu=False, max_channels_per_tile=8))
    assert jnp.allclose(out2, ref2, atol=2e-5, rtol=1e-5), "tiled-C path mismatch"

    # 4) Image batching (NB=4 in the reduce, NB2=4 in the conv), default path.
    x3 = jax.random.normal(kx3, (8, 4, 16, 16), dtype=jnp.float32)
    ref3 = spatial_attention_ref(x3, conv_weight)
    out3 = jax.block_until_ready(spatial_attention(x3, conv_weight))
    assert jnp.allclose(out3, ref3, atol=2e-2, rtol=1e-2), "batched-NB path mismatch"

    print("KERNEL_OK")
</pallas_src>

<mosaic_0001>
module attributes {stable_mosaic.version = 11 : i64} {
  func.func @kernel(%arg0: i32, %arg1: i32, %arg2: memref<1x4x256xf32, #tpu.memory_space<vmem>>, %arg3: memref<1x2x256xf32, #tpu.memory_space<vmem>>) attributes {dimension_semantics = [#tpu.dimension_semantics<parallel>, #tpu.dimension_semantics<arbitrary>], iteration_bounds = array<i64: 2, 1>, scalar_prefetch = 0 : i64, scratch_operands = 0 : i64, tpu.core_type = #tpu.core_type<tc>, window_params = [{transform_indices = @transform_0, window_bounds = array<i64: 1, 4, 256>}, {transform_indices = @transform_1, window_bounds = array<i64: 1, 2, 256>}]} {
    %cst = arith.constant 0.000000e+00 : f32
    %0 = vector.broadcast %cst : f32 to vector<1x256xf32>
    %cst_0 = arith.constant 0xFF800000 : f32
    %1 = vector.broadcast %cst_0 : f32 to vector<1x256xf32>
    %c0 = arith.constant 0 : index
    %c0_1 = arith.constant 0 : index
    %c0_2 = arith.constant 0 : index
    %2 = vector.load %arg2[%c0, %c0_1, %c0_2] : memref<1x4x256xf32, #tpu.memory_space<vmem>>, vector<1x4x256xf32>
    %cst_3 = arith.constant dense<0.000000e+00> : vector<1x256xf32>
    %3 = vector.multi_reduction <add>, %2, %cst_3 [1] : vector<1x4x256xf32> to vector<1x256xf32>
    %4 = arith.addf %0, %3 : vector<1x256xf32>
    %cst_4 = arith.constant dense<0xFF800000> : vector<1x256xf32>
    %5 = vector.multi_reduction <maximumf>, %2, %cst_4 [1] : vector<1x4x256xf32> to vector<1x256xf32>
    %6 = arith.maximumf %1, %5 : vector<1x256xf32>
    %cst_5 = arith.constant 2.500000e-01 : f32
    %7 = vector.broadcast %cst_5 : f32 to vector<1x256xf32>
    %8 = arith.mulf %4, %7 : vector<1x256xf32>
    %c0_6 = arith.constant 0 : index
    %c0_7 = arith.constant 0 : index
    %c0_8 = arith.constant 0 : index
    %9 = vector.load %arg3[%c0_6, %c0_7, %c0_8] : memref<1x2x256xf32, #tpu.memory_space<vmem>>, vector<1x1x256xf32>
    %10 = vector.shape_cast %9 : vector<1x1x256xf32> to vector<1x256xf32>
    %11 = vector.shape_cast %8 : vector<1x256xf32> to vector<1x1x256xf32>
    tpu.vector_store %arg3[%c0_6, %c0_7, %c0_8], %11 {strides = array<i32>} : memref<1x2x256xf32, #tpu.memory_space<vmem>>, vector<1x1x256xf32>,
    %c0_9 = arith.constant 0 : index
    %c1 = arith.constant 1 : index
    %c0_10 = arith.constant 0 : index
    %12 = vector.load %arg3[%c0_9, %c1, %c0_10] : memref<1x2x256xf32, #tpu.memory_space<vmem>>, vector<1x1x256xf32>
    %13 = vector.shape_cast %12 : vector<1x1x256xf32> to vector<1x256xf32>
    %14 = vector.shape_cast %6 : vector<1x256xf32> to vector<1x1x256xf32>
    tpu.vector_store %arg3[%c0_9, %c1, %c0_10], %14 {strides = array<i32>} : memref<1x2x256xf32, #tpu.memory_space<vmem>>, vector<1x1x256xf32>,
    return
  }
  func.func @transform_0(%arg0: i32, %arg1: i32) -> (i32, i32, i32) {
    %c0_i32 = arith.constant 0 : i32
    %c0_i32_0 = arith.constant 0 : i32
    return %arg0, %arg1, %c0_i32 : i32, i32, i32
  }
  func.func @transform_1(%arg0: i32, %arg1: i32) -> (i32, i32, i32) {
    %c0_i32 = arith.constant 0 : i32
    %c0_i32_0 = arith.constant 0 : i32
    %c0_i32_1 = arith.constant 0 : i32
    return %arg0, %c0_i32, %c0_i32_0 : i32, i32, i32
  }
}

</mosaic_0001>

<bundles_post_ra>
// kernel: tpu_custom_call.1
= control target key start
LH: loop header
LB: loop body
LE: loop exit
PB: predicated region body
PF: predicated region fallthrough
CT: control target
= control target key end

     0   :  { %6 = vsyncpa [#allocation3], 0  ;;  %s704_s0 = inlined_call_operand.hbm [shape: f32[2,4,256], index: 0, kind: input, shape index: {}]   ;;  %s705_s1 = inlined_call_operand.hbm [shape: f32[2,2,256], index: 1, kind: output, shape index: {}]  }
   0x1   :  { %8 = vsyncpa [#allocation3 + $0x1], 0 }
   0x2   :  { %9 = vsyncpa [#allocation4], 0 }
   0x3   :  { %11 = vsyncpa [#allocation4 + $0x1], 0  ;;  %s531_s6 = smov 0   ;;  %s533_s7 = smov 0  }
   0x4   :  { %s535_s8 = smov 0   ;;  %s537_s9 = smov 0  }
   0x5   :  { %s539_s10 = smov 0   ;;  %s541_s11 = smov 0  }
   0x6 LB: > { %s322_s12 = sadd.s32 4294967295, %s516_s11   ;;  %s323_s13 = sadd.s32 4294967294, %s516_s11   ;;  %s516_s11 = sphi %s541_s11, %s17_s11   ;;  %s512_s10 = sphi %s539_s10, %s721_s10   ;;  %s508_s9 = sphi %s537_s9, %s720_s9   ;;  %s504_s8 = sphi %s535_s8, %s719_s8   ;;  %s500_s7 = sphi %s533_s7, %s718_s7   ;;  %s496_s6 = sphi %s531_s6, %s717_s6  }
   0x7   : > { %s29_s14 = sadd.s32 1, %s512_s10  ;;  %s38_s15 = sadd.s32 1, %s504_s8 }
   0x8   : > { %p31_p0 = scmp.ge.s32.totalorder %s29_s14, 2  ;;  %p45_p1 = scmp.ne.s32.totalorder %s504_s8, %s500_s7 }
   0x9   : > { %p46_p2 = scmp.eq.s32.totalorder %s516_s11, 0  ;;  %p51_p3 = scmp.ne.s32.totalorder %s500_s7, %s496_s6 }
   0xa   : > { %s723_s14 = smov (%p31_p0, %s29_s14), 0  ;;  %p52_p5 = scmp.eq.s32.totalorder %s322_s12, 0 }
   0xb   : > { %p572_p4 = por %p46_p2, %p45_p1  ;;  %s33_s17 = ssub.s32 %s512_s10, %s723_s14 }
   0xc   : > { %p75_p6 = scmp.eq.s32.totalorder %s322_s12, 1  ;;  %p36_p7 = scmp.eq.s32.totalorder %s33_s17, 0 }
   0xd   : > { %p578_p8 = por %p52_p5, %p51_p3  ;;  %p81_p10 = scmp.eq.s32.totalorder %s323_s13, 1 }
   0xe   : > { %p582_p9 = por %p75_p6, %p45_p1  ;;  %p352_p13 = scmp.lt.s32.totalorder %s516_s11, 2 }
   0xf   : > { %s587_s20 = scalar_select %p36_p7, %s504_s8, %s38_s15  }
  0x10   : > { %s709_s19 = scalar_select %p582_p9, 1, 0 }
  0x11   : > { %p589_p11 = por %p81_p10, %p51_p3  ;;  %s101_s22 = sand.u32 1, %s504_s8  }
  0x12   : > { %s326_s23 = sshll.u32 %s101_s22, 3  ;;  %s338_s24 = sshll.u32 %s512_s10, 7 }
  0x13   : > { %s710_s21 = scalar_select %p589_p11, 1, 0 }
  0x14   : > { %s600_s27 = scalar_lea.hbm %s704_s0, %s338_s24  ;;  %s105_s28 = scalar_lea.vmem [#allocation2], %s326_s23 }
  0x15   : > { %s115_s29 = sshll.u32 %s105_s28, 4  ;;  %p606_p0 = pnand %p352_p13, %p572_p4  ;;  %s602_s29 = int_to_ptr.vmem [resolvable:$true] %s115_s29 }
  0x16   : > { %s102_s2 = scalar_lea.sflag [#allocation3], %s101_s22  ;;  %s404_s3 = scalar_lea.hbm %s600_s27, 128 }
  0x17   : > { %p405_p3 = scmp.ne.s32.totalorder %s600_s27, %s404_s3  ;;  %p406_p5 = pneg %p606_p0 }
  0x18   : > { %s409_s12 = scalar_lea.hbm %s704_s0, 256  ;;  %p410_p4 = scmp.lt.u32.totalorder %s600_s27, %s704_s0 }
  0x19   : > { %p407_p6 = pnand %p406_p5, %p405_p3  ;;  %p411_p10 = scmp.lt.u32.totalorder %s409_s12, %s404_s3 }
  0x1a   : > { %p413_p12 = scmp.lt.u32.totalorder %s404_s3, %s600_s27 }
  0x1b   : > { %p408_p7 = pneg %p407_p6  ;;  %p412_p13 = por %p411_p10, %p410_p4 }
  0x1d   : > { %p414_p1 = por %p413_p12, %p412_p13 }
  0x1f   : > { %p415_p2 = pnand %p414_p1, %p408_p7 }
  0x21   : > { %418 = shalt.err (!%p415_p2)
}
  0x22   : > { %s419_s16 = scalar_lea.vmem %s602_s29, 128  ;;  %s518_s17 = smov [#allocation2]  }
  0x23   : > { %p420_p3 = scmp.ne.s32.totalorder %s602_s29, %s419_s16  ;;  %s424_s22 = sshll.u32 %s518_s17, 4  ;;  %s425_s22 = int_to_ptr.vmem [resolvable:$false] %s424_s22 }
  0x24   : > { %s426_s23 = scalar_lea.vmem %s425_s22, 256  ;;  %p427_p9 = scmp.lt.s32.totalorder %s602_s29, %s425_s22 }
  0x25   : > { %p422_p6 = pnand %p420_p3, %p406_p5  ;;  %p428_p4 = scmp.lt.s32.totalorder %s426_s23, %s419_s16 }
  0x27   : > { %p423_p11 = pneg %p422_p6  ;;  %p429_p10 = por %p428_p4, %p427_p9 }
  0x29   : > { %p430_p12 = pnand %p429_p10, %p423_p11 }
  0x2b   : > { %433 = shalt.err (!%p430_p12)
}
  0x2c   : > { %347 = dma.hbm_to_vmem [thread:$0]  (!%p606_p0), %s600_s27, 128, %s602_s29, %s102_s2  }
  0x2d   : > { %p712_p1 = scmp.lt.s32.totalorder %s516_s11, 3  ;;  %p713_p2 = scmp.ge.s32.totalorder %s516_s11, 1 }
  0x2f   : > { %p121_p5 = pnand %p713_p2, %p712_p1 }
  0x30   : > { %s642_s24 = sand.u32 (!%p121_p5), 1, %s500_s7  }
  0x31   : > { %124 = sbr.rel (%p121_p5) target bundleno = 95 (0x5f), region = 24  ;;  %s330_s25 = sshll.u32 (!%p121_p5), %s642_s24, 3 }
  0x32   : > { %s127_s26 = scalar_lea.sflag (!%p121_p5), [#allocation3], %s642_s24  ;;  %s130_s28 = scalar_lea.vmem (!%p121_p5), [#allocation2], %s330_s25 }
  0x38   : > { %487 = dma.done.wait (%p578_p8), %s127_s26, 128  }
  0x39   : > { %489 = vsyncadd (%p578_p8), %s127_s26, 4294967168  ;;  %vm153_vm0 = vcmask 1043456   ;;  %v149_v0 = vld [vmem:[%s130_s28] sm:$0xff]  ;;  %v519_v12 = vmov 1966171168   ;;  %v192_v14 = vlaneseq  ;;  %s331_s18 = sshll.u32 %s642_s24, 2 }
  0x3a   : > { %v151_v1 = vcombine.high %v149_v0, %v149_v0  ;;  %v154_v2 = vsel %vm153_vm0, %v149_v0, 0.0  ;;  %v170_v3 = vsel %vm153_vm0, %v149_v0, -inf  ;;  %v190_v13 = vunpack.c.l.s4 %v519_v12  ;;  %s148_s27 = scalar_lea.vmem [#allocation5], %s331_s18  ;;  %s339_s30 = sshll.u32 %s508_s9, 6 }
  0x3b   : > { %v155_v4 = vrot.slane %v154_v2, 4  ;;  %v171_v5 = vrot.slane %v170_v3, 4  ;;  %v193_v24 = vshrl.u32 %v192_v14, 7  ;;  %vm206_vm1 = vcmp.lt.s32.totalorder %v192_v14, 256  ;;  %s244_s29 = sshll.u32 %s148_s27, 4  ;;  %s657_s4 = scalar_lea.hbm %s705_s1, %s339_s30  ;;  %s652_s29 = int_to_ptr.vmem [resolvable:$true] %s244_s29 }
  0x3c   : > { %v161_v6 = vsel %vm153_vm0, %v151_v1, 0.0  ;;  %v177_v7 = vsel %vm153_vm0, %v151_v1, -inf  ;;  %v191_v23 = vunpack.c.0.s8 %v190_v13  ;;  %s230_s5 = scalar_lea.sflag [#allocation4], %s642_s24  ;;  %s434_s12 = scalar_lea.vmem %s652_s29, 64 }
  0x3d   : > { %v156_v8 = vadd.f32 %v155_v4, %v154_v2  ;;  %v162_v9 = vrot.slane %v161_v6, 4  ;;  %v172_v10 = vmax.f32 %v170_v3, %v171_v5  ;;  %v178_v11 = vrot.slane %v177_v7, 4  ;;  %p435_p8 = scmp.ne.s32.totalorder %s652_s29, %s434_s12  ;;  %p714_p9 = scmp.ne.s32.totalorder %s709_s19, 0 }
  0x3e   : > { %v194_v35 = vsub.s32 %v191_v23, %v193_v24  ;;  %s520_s9 = smov [#allocation5]  }
  0x3f   : > { %v157_v15 = vrot.slane %v156_v8, 2  ;;  %v163_v16 = vadd.f32 %v162_v9, %v161_v6  ;;  %v173_v17 = vrot.slane %v172_v10, 2  ;;  %v179_v18 = vmax.f32 %v177_v7, %v178_v11  ;;  %p436_p11 = pnand %p435_p8, %p714_p9  ;;  %s438_s13 = sshll.u32 %s520_s9, 4  ;;  %s439_s13 = int_to_ptr.vmem [resolvable:$false] %s438_s13 }
  0x40   : > { %s440_s15 = scalar_lea.vmem %s439_s13, 128  ;;  %p441_p7 = scmp.lt.s32.totalorder %s652_s29, %s439_s13 }
  0x41   : > { %v158_v19 = vadd.f32 %v157_v15, %v156_v8  ;;  %v164_v20 = vrot.slane %v163_v16, 2  ;;  %v174_v21 = vmax.f32 %v172_v10, %v173_v17  ;;  %v180_v22 = vrot.slane %v179_v18, 2  ;;  %p437_p0 = pneg %p436_p11  ;;  %p442_p13 = scmp.lt.s32.totalorder %s440_s15, %s434_s12 }
  0x43   : > { %v159_v25 = vrot.slane %v158_v19, 1  ;;  %v165_v26 = vadd.f32 %v164_v20, %v163_v16  ;;  %v175_v27 = vrot.slane %v174_v21, 1  ;;  %v181_v28 = vmax.f32 %v179_v18, %v180_v22  ;;  %p443_p3 = por %p442_p13, %p441_p7 }
  0x45   : > { %v160_v29 = vadd.f32 %v159_v25, %v158_v19  ;;  %v166_v30 = vrot.slane %v165_v26, 1  ;;  %v176_v31 = vmax.f32 %v174_v21, %v175_v27  ;;  %v182_v32 = vrot.slane %v181_v28, 1  ;;  %p444_p6 = pnand %p443_p3, %p437_p0 }
  0x47   : > { %v167_v33 = vadd.f32 %v166_v30, %v165_v26  ;;  %v184_v34 = vmul.f32 0.25, %v160_v29  ;;  %v183_v36 = vmax.f32 %v181_v28, %v182_v32 }
  0x49   : > { %v185_v37 = vmul.f32 0.25, %v167_v33  ;;  %v211_v38 = vcombine.low %v176_v31, %v183_v36 }
  0x4b   : > { %v188_v39 = vcombine.low %v184_v34, %v185_v37  ;;  %v218_v40 = vrot.slane %v211_v38, %v194_v35 }
  0x4d   : > { %v195_v41 = vrot.slane %v188_v39, %v194_v35  ;;  %v225_v42 = vrot.slane %v218_v40, %v194_v35 }
  0x4f   : > { %v202_v43 = vrot.slane %v195_v41, %v194_v35  ;;  %332 = vst.msk [vmem:[%s148_s27 + $0x1] ss:$2 sm:$0x3] %vm206_vm1, %v225_v42 }
  0x51   : > { %208 = vst.msk [vmem:[%s148_s27] ss:$2 sm:$0x3] %vm206_vm1, %v202_v43 }
  0x52   : > { %447 = shalt.err (!%p444_p6)
}
  0x53   : > { %s448_s16 = scalar_lea.hbm %s657_s4, 64  ;;  %s452_s23 = scalar_lea.hbm %s705_s1, 128 }
  0x54   : > { %p449_p4 = scmp.ne.s32.totalorder %s657_s4, %s448_s16  ;;  %p453_p1 = scmp.lt.u32.totalorder %s657_s4, %s705_s1 }
  0x55   : > { %p454_p2 = scmp.lt.u32.totalorder %s452_s23, %s448_s16  ;;  %p456_p8 = scmp.lt.u32.totalorder %s448_s16, %s657_s4 }
  0x56   : > { %p450_p10 = pnand %p449_p4, %p714_p9 }
  0x57   : > { %p455_p5 = por %p454_p2, %p453_p1 }
  0x58   : > { %p451_p12 = pneg %p450_p10 }
  0x59   : > { %p457_p11 = por %p456_p8, %p455_p5 }
  0x5b   : > { %p458_p0 = pnand %p457_p11, %p451_p12 }
  0x5d   : > { %461 = shalt.err (!%p458_p0)
}
  0x5e   : > { %342 = dma.vmem_to_hbm [thread:$0]  (%p714_p9), %s652_s29, 64, %s657_s4, %s230_s5  }
  0x5f PF: > { %s256_s26 = sand.u32 1, %s496_s6   ;;  %p715_p7 = scmp.ne.s32.totalorder %s710_s21, 0 }
  0x60   : > { %p716_p13 = scmp.ge.s32.totalorder %s516_s11, 2  ;;  %s257_s28 = scalar_lea.sflag [#allocation4], %s256_s26 }
  0x62   : > { %p349_p3 = pnand %p716_p13, %p715_p7 }
  0x64   : > { %491 = dma.done.wait (!%p349_p3), %s257_s28, 64  }
  0x65   : > { %493 = vsyncadd (!%p349_p3), %s257_s28, 4294967232  ;;  %s17_s11 = sadd.s32 1, %s516_s11   ;;  %s717_s6 = smov %s500_s7 }
  0x66   : > { %p14_p6 = scmp.ge.s32.totalorder %s17_s11, 4   ;;  %s718_s7 = smov %s504_s8 }
  0x67   : > { %s719_s8 = smov %s587_s20  ;;  %s720_s9 = smov %s512_s10 }
  0x68   : > { %s721_s10 = smov %s723_s14  ;;  %16 = sbr.rel (!%p14_p6) target bundleno = 6 (0x6), region = 70 }
  0x6f   :  { %262 = vsyncpa [#allocation3], 1 }
  0x70   :  { %264 = vsyncpa [#allocation3 + $0x1], 1 }
  0x71   :  { %265 = vsyncpa [#allocation4], 1 }
  0x72   :  { %267 = vsyncpa [#allocation4 + $0x1], 1 }

</bundles_post_ra>
